<compile_context>
chip_gen: v6e
topology: v6e:2x2x1
jax: 0.10.0
libtpu: 0.0.40
codegen_flags: <defaults>
</compile_context>

<pallas_src>
import jax
import jax.numpy as jnp
from jax.experimental import pallas as pl
from jax.experimental.pallas import tpu as pltpu

LANE = 128
SUBLANE = 8


def _round_up(x, m):
    return ((x + m - 1) // m) * m


# ------------------------- Pallas kernel (hot path) -------------------------

def _dynamics_kernel(x_ref, a_ref, eps_ref,
                     w1x_ref, w1a_ref, b1_ref,
                     w2_ref, b2_ref,
                     wh_ref, bh_ref,
                     maxls_ref, minls_ref,
                     pred_ref):
    """One batch tile of the ProbabilisticDynamicsModel forward pass."""

    def softplus(z):
        # numerically-stable softplus; log1p is cheaper/more accurate on EUP path
        return jnp.maximum(z, 0.0) + jnp.log1p(jnp.exp(-jnp.abs(z)))

    # encoder layer 1: concat(x, a) @ W1 == x @ W1x + a @ W1a  (no concat needed)
    h = (jnp.dot(x_ref[...], w1x_ref[...], preferred_element_type=jnp.float32)
         + jnp.dot(a_ref[...], w1a_ref[...], preferred_element_type=jnp.float32)
         + b1_ref[...])
    h = jnp.maximum(h, 0.0)
    # encoder layer 2
    h = jnp.dot(h, w2_ref[...], preferred_element_type=jnp.float32) + b2_ref[...]
    h = jnp.maximum(h, 0.0)

    # fused heads: single MXU pass producing [mu | logstd], each lane-padded
    heads = jnp.dot(h, wh_ref[...], preferred_element_type=jnp.float32) + bh_ref[...]
    out_pad = maxls_ref.shape[1]          # static, multiple of 128 -> cheap slices
    mu = heads[:, :out_pad]
    logstd = heads[:, out_pad:]

    # soft clamping of logstd (f32 tail)
    maxls = maxls_ref[...]
    minls = minls_ref[...]
    logstd = maxls - softplus(maxls - logstd)
    logstd = minls + softplus(logstd - minls)

    # reparameterized sample: pred = mu + std * eps  -> one lane-dense store
    pred_ref[...] = mu + jnp.exp(logstd) * eps_ref[...]


# ------------------------------ JAX wrapper ---------------------------------

def probabilistic_dynamics_forward(x, action, eps, params, *, tile_b=256):
    """Returns (next_x, next_reward) exactly like the PyTorch forward()."""
    B, obs_dim = x.shape
    _, act_dim = action.shape
    (w1, b1, w2, b2, wmu, bmu, wls, bls, maxls, minls) = params
    out_dim = wmu.shape[1]                         # obs_dim + 1
    out_pad = _round_up(out_dim, LANE)             # lane-dense head/output width

    # ---- batch tiling (pad B up to a sublane / tile multiple) ----
    tb = min(tile_b, _round_up(B, SUBLANE))
    b_pad = _round_up(B, tb)
    pad_b = b_pad - B
    pad_o = out_pad - out_dim

    x_p = jnp.pad(x, ((0, pad_b), (0, 0)))
    a_p = jnp.pad(action, ((0, pad_b), (0, 0)))
    eps_p = jnp.pad(eps, ((0, pad_b), (0, pad_o)))

    # ---- one-time parameter layout prep (plain-JAX glue) ----
    w1x = w1[:obs_dim]                             # (obs_dim, hidden)
    w1a = w1[obs_dim:]                             # (act_dim, hidden)
    wh = jnp.concatenate([jnp.pad(wmu, ((0, 0), (0, pad_o))),
                          jnp.pad(wls, ((0, 0), (0, pad_o)))], axis=1)
    bh = jnp.concatenate([jnp.pad(bmu, ((0, 0), (0, pad_o))),
                          jnp.pad(bls, ((0, 0), (0, pad_o)))], axis=1)
    maxls_p = jnp.pad(maxls, ((0, 0), (0, pad_o)), constant_values=2.0)
    minls_p = jnp.pad(minls, ((0, 0), (0, pad_o)), constant_values=-10.0)

    weight_args = (w1x, w1a, b1, w2, b2, wh, bh, maxls_p, minls_p)

    def tiled(feat):
        return pl.BlockSpec((tb, feat), lambda i: (i, 0))

    def resident(arr):
        # constant block index -> weight stays VMEM-resident across grid steps
        return pl.BlockSpec(arr.shape, lambda i: (0, 0))

    in_specs = ([tiled(obs_dim), tiled(act_dim), tiled(out_pad)]
                + [resident(a) for a in weight_args])

    pred_pad = pl.pallas_call(
        _dynamics_kernel,
        out_shape=jax.ShapeDtypeStruct((b_pad, out_pad), jnp.float32),
        grid_spec=pltpu.PrefetchScalarGridSpec(
            num_scalar_prefetch=0,
            grid=(b_pad // tb,),
            in_specs=in_specs,
            out_specs=pl.BlockSpec((tb, out_pad), lambda i: (i, 0)),
        ),
        compiler_params=pltpu.CompilerParams(
            dimension_semantics=("parallel",)),   # megacore-shardable on v7x
    )(x_p, a_p, eps_p, *weight_args)

    # cheap XLA-side split/add on the un-padded region
    pred = pred_pad[:B, :out_dim]
    next_x = x + pred[:, :obs_dim]
    next_reward = pred[:, obs_dim:obs_dim + 1]
    return next_x, next_reward


# ------------------------- deterministic parameter init ---------------------

def _spectral_normalize(w, n_iter=100):
    # Power-iteration spectral norm — mirrors torch spectral_norm at convergence.
    # w: [in, out].
    u = jnp.ones((w.shape[1],), w.dtype) / jnp.sqrt(float(w.shape[1]))
    for _ in range(n_iter):
        v = w @ u
        v = v / (jnp.linalg.norm(v) + 1e-12)
        u = w.T @ v
        u = u / (jnp.linalg.norm(u) + 1e-12)
    sigma = v @ (w @ u)
    return w / sigma


def make_params(key, obs_dim, act_dim, hidden, out_dim):
    ks = jax.random.split(key, 8)
    scale = 0.1
    w1 = scale * jax.random.normal(ks[0], (obs_dim + act_dim, hidden), jnp.float32)
    b1 = scale * jax.random.normal(ks[1], (1, hidden), jnp.float32)
    w2 = scale * jax.random.normal(ks[2], (hidden, hidden), jnp.float32)
    b2 = scale * jax.random.normal(ks[3], (1, hidden), jnp.float32)
    wmu = scale * jax.random.normal(ks[4], (hidden, out_dim), jnp.float32)
    bmu = scale * jax.random.normal(ks[5], (1, out_dim), jnp.float32)
    wls = scale * jax.random.normal(ks[6], (hidden, out_dim), jnp.float32)
    bls = scale * jax.random.normal(ks[7], (1, out_dim), jnp.float32)

    # spectral norm on encoder layers + mu head (as in __init__)
    w1 = _spectral_normalize(w1)
    w2 = _spectral_normalize(w2)
    wmu = _spectral_normalize(wmu)

    maxls = jnp.full((1, out_dim), 2.0, jnp.float32)
    minls = jnp.full((1, out_dim), -10.0, jnp.float32)
    return (w1, b1, w2, b2, wmu, bmu, wls, bls, maxls, minls)


# ------------------------------ reference (pure JAX) -------------------------

def _reference_forward(x, action, eps, params):
    (w1, b1, w2, b2, wmu, bmu, wls, bls, maxls, minls) = params
    xa = jnp.concatenate([x, action], axis=1)
    h = jax.nn.relu(xa @ w1 + b1)
    h = jax.nn.relu(h @ w2 + b2)
    mu = h @ wmu + bmu
    logstd = h @ wls + bls
    logstd = maxls - jax.nn.softplus(maxls - logstd)
    logstd = minls + jax.nn.softplus(logstd - minls)
    pred = mu + jnp.exp(logstd) * eps
    return x + pred[:, :-1], pred[:, -1:]


# ----------------------------------- main ------------------------------------

if __name__ == "__main__":
    B, OBS, ACT, HID = 8, 16, 8, 32
    OUT = OBS + 1  # observation_size + 1 (reward)

    key = jax.random.PRNGKey(0)
    kx, ka, ke, kp = jax.random.split(key, 4)
    x = jax.random.normal(kx, (B, OBS), jnp.float32)
    action = jax.random.normal(ka, (B, ACT), jnp.float32)
    eps = jax.random.normal(ke, (B, OUT), jnp.float32)   # Normal.rsample noise
    params = make_params(kp, OBS, ACT, HID, OUT)

    next_x, next_reward = probabilistic_dynamics_forward(x, action, eps, params)
    jax.block_until_ready((next_x, next_reward))

    ref_x, ref_r = _reference_forward(x, action, eps, params)
    assert next_x.shape == (B, OBS) and next_reward.shape == (B, 1)
    assert jnp.allclose(next_x, ref_x, rtol=1e-3, atol=1e-3)
    assert jnp.allclose(next_reward, ref_r, rtol=1e-3, atol=1e-3)

    # TODO(synk): for production on v6e/v7x, cast matmul operands to bf16
    # (keep f32 accumulation + f32 logstd clamp/exp tail) and size tile_b
    # against v7x's 64 MiB VMEM.
    print("KERNEL_OK")
</pallas_src>

<mosaic_0001>
module attributes {stable_mosaic.version = 11 : i64} {
  func.func @_dynamics_kernel(%arg0: i32, %arg1: memref<8x16xf32, #tpu.memory_space<vmem>>, %arg2: memref<8x8xf32, #tpu.memory_space<vmem>>, %arg3: memref<8x128xf32, #tpu.memory_space<vmem>>, %arg4: memref<16x32xf32, #tpu.memory_space<vmem>>, %arg5: memref<8x32xf32, #tpu.memory_space<vmem>>, %arg6: memref<1x32xf32, #tpu.memory_space<vmem>>, %arg7: memref<32x32xf32, #tpu.memory_space<vmem>>, %arg8: memref<1x32xf32, #tpu.memory_space<vmem>>, %arg9: memref<32x256xf32, #tpu.memory_space<vmem>>, %arg10: memref<1x256xf32, #tpu.memory_space<vmem>>, %arg11: memref<1x128xf32, #tpu.memory_space<vmem>>, %arg12: memref<1x128xf32, #tpu.memory_space<vmem>>, %arg13: memref<8x128xf32, #tpu.memory_space<vmem>>) attributes {dimension_semantics = [#tpu.dimension_semantics<parallel>], iteration_bounds = array<i64: 1>, scalar_prefetch = 0 : i64, scratch_operands = 0 : i64, tpu.core_type = #tpu.core_type<tc>, window_params = [{transform_indices = @transform_0, window_bounds = array<i64: 8, 16>}, {transform_indices = @transform_1, window_bounds = array<i64: 8, 8>}, {transform_indices = @transform_2, window_bounds = array<i64: 8, 128>}, {pipeline_mode = #tpu.pipeline_mode<synchronous>, transform_indices = @transform_3, window_bounds = array<i64: 16, 32>}, {pipeline_mode = #tpu.pipeline_mode<synchronous>, transform_indices = @transform_4, window_bounds = array<i64: 8, 32>}, {pipeline_mode = #tpu.pipeline_mode<synchronous>, transform_indices = @transform_5, window_bounds = array<i64: 1, 32>}, {pipeline_mode = #tpu.pipeline_mode<synchronous>, transform_indices = @transform_6, window_bounds = array<i64: 32, 32>}, {pipeline_mode = #tpu.pipeline_mode<synchronous>, transform_indices = @transform_7, window_bounds = array<i64: 1, 32>}, {pipeline_mode = #tpu.pipeline_mode<synchronous>, transform_indices = @transform_8, window_bounds = array<i64: 32, 256>}, {pipeline_mode = #tpu.pipeline_mode<synchronous>, transform_indices = @transform_9, window_bounds = array<i64: 1, 256>}, {pipeline_mode = #tpu.pipeline_mode<synchronous>, transform_indices = @transform_10, window_bounds = array<i64: 1, 128>}, {pipeline_mode = #tpu.pipeline_mode<synchronous>, transform_indices = @transform_11, window_bounds = array<i64: 1, 128>}, {transform_indices = @transform_12, window_bounds = array<i64: 8, 128>}]} {
    %c0 = arith.constant 0 : index
    %c0_0 = arith.constant 0 : index
    %0 = vector.load %arg1[%c0, %c0_0] : memref<8x16xf32, #tpu.memory_space<vmem>>, vector<8x16xf32>
    %c0_1 = arith.constant 0 : index
    %c0_2 = arith.constant 0 : index
    %1 = vector.load %arg4[%c0_1, %c0_2] : memref<16x32xf32, #tpu.memory_space<vmem>>, vector<16x32xf32>
    %cst = arith.constant dense<0.000000e+00> : vector<8x32xf32>
    %2 = tpu.matmul %0, %1, %cst {dimension_numbers = #tpu.dot_dimension_numbers<[1], [0], [0], [1], [0, 0, 1, 1], [], []>} : vector<8x16xf32>, vector<16x32xf32>, vector<8x32xf32> -> vector<8x32xf32>
    %c0_3 = arith.constant 0 : index
    %c0_4 = arith.constant 0 : index
    %3 = vector.load %arg2[%c0_3, %c0_4] : memref<8x8xf32, #tpu.memory_space<vmem>>, vector<8x8xf32>
    %c0_5 = arith.constant 0 : index
    %c0_6 = arith.constant 0 : index
    %4 = vector.load %arg5[%c0_5, %c0_6] : memref<8x32xf32, #tpu.memory_space<vmem>>, vector<8x32xf32>
    %cst_7 = arith.constant dense<0.000000e+00> : vector<8x32xf32>
    %5 = tpu.matmul %3, %4, %cst_7 {dimension_numbers = #tpu.dot_dimension_numbers<[1], [0], [0], [1], [0, 0, 1, 1], [], []>} : vector<8x8xf32>, vector<8x32xf32>, vector<8x32xf32> -> vector<8x32xf32>
    %6 = arith.addf %2, %5 : vector<8x32xf32>
    %c0_8 = arith.constant 0 : index
    %c0_9 = arith.constant 0 : index
    %7 = vector.load %arg6[%c0_8, %c0_9] : memref<1x32xf32, #tpu.memory_space<vmem>>, vector<1x32xf32>
    %8 = vector.broadcast %7 : vector<1x32xf32> to vector<8x32xf32>
    %9 = arith.addf %6, %8 : vector<8x32xf32>
    %cst_10 = arith.constant 0.000000e+00 : f32
    %10 = vector.broadcast %cst_10 : f32 to vector<8x32xf32>
    %11 = arith.maximumf %9, %10 : vector<8x32xf32>
    %c0_11 = arith.constant 0 : index
    %c0_12 = arith.constant 0 : index
    %12 = vector.load %arg7[%c0_11, %c0_12] : memref<32x32xf32, #tpu.memory_space<vmem>>, vector<32x32xf32>
    %cst_13 = arith.constant dense<0.000000e+00> : vector<8x32xf32>
    %13 = tpu.matmul %11, %12, %cst_13 {dimension_numbers = #tpu.dot_dimension_numbers<[1], [0], [0], [1], [0, 0, 1, 1], [], []>} : vector<8x32xf32>, vector<32x32xf32>, vector<8x32xf32> -> vector<8x32xf32>
    %c0_14 = arith.constant 0 : index
    %c0_15 = arith.constant 0 : index
    %14 = vector.load %arg8[%c0_14, %c0_15] : memref<1x32xf32, #tpu.memory_space<vmem>>, vector<1x32xf32>
    %15 = vector.broadcast %14 : vector<1x32xf32> to vector<8x32xf32>
    %16 = arith.addf %13, %15 : vector<8x32xf32>
    %cst_16 = arith.constant 0.000000e+00 : f32
    %17 = vector.broadcast %cst_16 : f32 to vector<8x32xf32>
    %18 = arith.maximumf %16, %17 : vector<8x32xf32>
    %c0_17 = arith.constant 0 : index
    %c0_18 = arith.constant 0 : index
    %19 = vector.load %arg9[%c0_17, %c0_18] : memref<32x256xf32, #tpu.memory_space<vmem>>, vector<32x256xf32>
    %cst_19 = arith.constant dense<0.000000e+00> : vector<8x256xf32>
    %20 = tpu.matmul %18, %19, %cst_19 {dimension_numbers = #tpu.dot_dimension_numbers<[1], [0], [0], [1], [0, 0, 1, 1], [], []>} : vector<8x32xf32>, vector<32x256xf32>, vector<8x256xf32> -> vector<8x256xf32>
    %c0_20 = arith.constant 0 : index
    %c0_21 = arith.constant 0 : index
    %21 = vector.load %arg10[%c0_20, %c0_21] : memref<1x256xf32, #tpu.memory_space<vmem>>, vector<1x256xf32>
    %22 = vector.broadcast %21 : vector<1x256xf32> to vector<8x256xf32>
    %23 = arith.addf %20, %22 : vector<8x256xf32>
    %24 = vector.extract_strided_slice %23 {offsets = [0, 0], sizes = [8, 128], strides = [1, 1]} : vector<8x256xf32> to vector<8x128xf32>
    %25 = vector.extract_strided_slice %23 {offsets = [0, 128], sizes = [8, 128], strides = [1, 1]} : vector<8x256xf32> to vector<8x128xf32>
    %c0_22 = arith.constant 0 : index
    %c0_23 = arith.constant 0 : index
    %26 = vector.load %arg11[%c0_22, %c0_23] : memref<1x128xf32, #tpu.memory_space<vmem>>, vector<1x128xf32>
    %c0_24 = arith.constant 0 : index
    %c0_25 = arith.constant 0 : index
    %27 = vector.load %arg12[%c0_24, %c0_25] : memref<1x128xf32, #tpu.memory_space<vmem>>, vector<1x128xf32>
    %28 = vector.broadcast %26 : vector<1x128xf32> to vector<8x128xf32>
    %29 = arith.subf %28, %25 : vector<8x128xf32>
    %cst_26 = arith.constant 0.000000e+00 : f32
    %30 = vector.broadcast %cst_26 : f32 to vector<8x128xf32>
    %31 = arith.maximumf %29, %30 : vector<8x128xf32>
    %32 = math.absf %29 : vector<8x128xf32>
    %cst_27 = arith.constant 0.000000e+00 : f32
    %33 = vector.broadcast %cst_27 : f32 to vector<8x128xf32>
    %34 = arith.subf %33, %32 : vector<8x128xf32>
    %35 = math.exp %34 : vector<8x128xf32>
    %36 = math.log1p %35 : vector<8x128xf32>
    %37 = arith.addf %31, %36 : vector<8x128xf32>
    %38 = vector.broadcast %26 : vector<1x128xf32> to vector<8x128xf32>
    %39 = arith.subf %38, %37 : vector<8x128xf32>
    %40 = vector.broadcast %27 : vector<1x128xf32> to vector<8x128xf32>
    %41 = arith.subf %39, %40 : vector<8x128xf32>
    %cst_28 = arith.constant 0.000000e+00 : f32
    %42 = vector.broadcast %cst_28 : f32 to vector<8x128xf32>
    %43 = arith.maximumf %41, %42 : vector<8x128xf32>
    %44 = math.absf %41 : vector<8x128xf32>
    %cst_29 = arith.constant 0.000000e+00 : f32
    %45 = vector.broadcast %cst_29 : f32 to vector<8x128xf32>
    %46 = arith.subf %45, %44 : vector<8x128xf32>
    %47 = math.exp %46 : vector<8x128xf32>
    %48 = math.log1p %47 : vector<8x128xf32>
    %49 = arith.addf %43, %48 : vector<8x128xf32>
    %50 = vector.broadcast %27 : vector<1x128xf32> to vector<8x128xf32>
    %51 = arith.addf %50, %49 : vector<8x128xf32>
    %52 = math.exp %51 : vector<8x128xf32>
    %c0_30 = arith.constant 0 : index
    %c0_31 = arith.constant 0 : index
    %53 = vector.load %arg3[%c0_30, %c0_31] : memref<8x128xf32, #tpu.memory_space<vmem>>, vector<8x128xf32>
    %54 = arith.mulf %52, %53 : vector<8x128xf32>
    %55 = arith.addf %24, %54 : vector<8x128xf32>
    %c0_32 = arith.constant 0 : index
    %c0_33 = arith.constant 0 : index
    %56 = vector.load %arg13[%c0_32, %c0_33] : memref<8x128xf32, #tpu.memory_space<vmem>>, vector<8x128xf32>
    tpu.vector_store %arg13[%c0_32, %c0_33], %55 {strides = array<i32>} : memref<8x128xf32, #tpu.memory_space<vmem>>, vector<8x128xf32>,
    return
  }
  func.func @transform_0(%arg0: i32) -> (i32, i32) {
    %c0_i32 = arith.constant 0 : i32
    %c0_i32_0 = arith.constant 0 : i32
    return %arg0, %c0_i32 : i32, i32
  }
  func.func @transform_1(%arg0: i32) -> (i32, i32) {
    %c0_i32 = arith.constant 0 : i32
    %c0_i32_0 = arith.constant 0 : i32
    return %arg0, %c0_i32 : i32, i32
  }
  func.func @transform_2(%arg0: i32) -> (i32, i32) {
    %c0_i32 = arith.constant 0 : i32
    %c0_i32_0 = arith.constant 0 : i32
    return %arg0, %c0_i32 : i32, i32
  }
  func.func @transform_3(%arg0: i32) -> (i32, i32) {
    %c0_i32 = arith.constant 0 : i32
    %c0_i32_0 = arith.constant 0 : i32
    %c0_i32_1 = arith.constant 0 : i32
    return %c0_i32, %c0_i32_0 : i32, i32
  }
  func.func @transform_4(%arg0: i32) -> (i32, i32) {
    %c0_i32 = arith.constant 0 : i32
    %c0_i32_0 = arith.constant 0 : i32
    %c0_i32_1 = arith.constant 0 : i32
    return %c0_i32, %c0_i32_0 : i32, i32
  }
  func.func @transform_5(%arg0: i32) -> (i32, i32) {
    %c0_i32 = arith.constant 0 : i32
    %c0_i32_0 = arith.constant 0 : i32
    %c0_i32_1 = arith.constant 0 : i32
    return %c0_i32, %c0_i32_0 : i32, i32
  }
  func.func @transform_6(%arg0: i32) -> (i32, i32) {
    %c0_i32 = arith.constant 0 : i32
    %c0_i32_0 = arith.constant 0 : i32
    %c0_i32_1 = arith.constant 0 : i32
    return %c0_i32, %c0_i32_0 : i32, i32
  }
  func.func @transform_7(%arg0: i32) -> (i32, i32) {
    %c0_i32 = arith.constant 0 : i32
    %c0_i32_0 = arith.constant 0 : i32
    %c0_i32_1 = arith.constant 0 : i32
    return %c0_i32, %c0_i32_0 : i32, i32
  }
  func.func @transform_8(%arg0: i32) -> (i32, i32) {
    %c0_i32 = arith.constant 0 : i32
    %c0_i32_0 = arith.constant 0 : i32
    %c0_i32_1 = arith.constant 0 : i32
    return %c0_i32, %c0_i32_0 : i32, i32
  }
  func.func @transform_9(%arg0: i32) -> (i32, i32) {
    %c0_i32 = arith.constant 0 : i32
    %c0_i32_0 = arith.constant 0 : i32
    %c0_i32_1 = arith.constant 0 : i32
    return %c0_i32, %c0_i32_0 : i32, i32
  }
  func.func @transform_10(%arg0: i32) -> (i32, i32) {
    %c0_i32 = arith.constant 0 : i32
    %c0_i32_0 = arith.constant 0 : i32
    %c0_i32_1 = arith.constant 0 : i32
    return %c0_i32, %c0_i32_0 : i32, i32
  }
  func.func @transform_11(%arg0: i32) -> (i32, i32) {
    %c0_i32 = arith.constant 0 : i32
    %c0_i32_0 = arith.constant 0 : i32
    %c0_i32_1 = arith.constant 0 : i32
    return %c0_i32, %c0_i32_0 : i32, i32
  }
  func.func @transform_12(%arg0: i32) -> (i32, i32) {
    %c0_i32 = arith.constant 0 : i32
    %c0_i32_0 = arith.constant 0 : i32
    return %arg0, %c0_i32 : i32, i32
  }
}

</mosaic_0001>

<bundles_post_ra>
// kernel: tpu_custom_call.1
= control target key start
LH: loop header
LB: loop body
LE: loop exit
PB: predicated region body
PF: predicated region fallthrough
CT: control target
= control target key end

     0   :  { %17 = vsyncpa [#allocation3], 0  ;;  %s901_s0 = inlined_call_operand.hbm [shape: f32[8,16], index: 0, kind: input, shape index: {}]   ;;  %s902_s1 = inlined_call_operand.hbm [shape: f32[8,8], index: 1, kind: input, shape index: {}]   ;;  %s903_s2 = inlined_call_operand.hbm [shape: f32[8,128], index: 2, kind: input, shape index: {}]   ;;  %s904_s3 = inlined_call_operand.hbm [shape: f32[16,32], index: 3, kind: input, shape index: {}]   ;;  %s905_s4 = inlined_call_operand.hbm [shape: f32[8,32], index: 4, kind: input, shape index: {}]   ;;  %s906_s5 = inlined_call_operand.vmem [shape: f32[1,32], index: 5, kind: input, shape index: {}]   ;;  %s907_s6 = inlined_call_operand.hbm [shape: f32[32,32], index: 6, kind: input, shape index: {}]   ;;  %s908_s7 = inlined_call_operand.vmem [shape: f32[1,32], index: 7, kind: input, shape index: {}]   ;;  %s909_s8 = inlined_call_operand.hbm [shape: f32[32,256], index: 8, kind: input, shape index: {}]   ;;  %s910_s9 = inlined_call_operand.vmem [shape: f32[1,256], index: 9, kind: input, shape index: {}]   ;;  %s911_s10 = inlined_call_operand.vmem [shape: f32[1,128], index: 10, kind: input, shape index: {}]   ;;  %s912_s11 = inlined_call_operand.vmem [shape: f32[1,128], index: 11, kind: input, shape index: {}]   ;;  %s913_s12 = inlined_call_operand.hbm [shape: f32[8,128], index: 12, kind: output, shape index: {}]  }
   0x1   :  { %18 = vsyncpa [#allocation6], 0 }
   0x2   :  { %19 = vsyncpa [#allocation9], 0 }
   0x3   :  { %20 = vsyncpa [#allocation12], 0 }
   0x4   :  { %21 = vsyncpa [#allocation4], 0  ;;  %s778_s21 = smov [#allocation5]   ;;  %s779_s23 = smov [#allocation8]  }
   0x5   :  { %s38_s22 = sshll.u32 %s778_s21, 4  ;;  %s57_s24 = sshll.u32 %s779_s23, 4  ;;  %s39_s22 = int_to_ptr.vmem [resolvable:$true] %s38_s22  ;;  %s58_s24 = int_to_ptr.vmem [resolvable:$true] %s57_s24 }
   0x6   :  { %s616_s25 = scalar_lea.vmem %s39_s22, 128  ;;  %p621_p1 = scmp.lt.s32.totalorder %s39_s22, %s39_s22 }
   0x7   :  { %p617_p0 = scmp.ne.s32.totalorder %s39_s22, %s616_s25  ;;  %p622_p2 = scmp.lt.s32.totalorder %s616_s25, %s616_s25 }
   0x9   :  { %p623_p3 = por %p622_p2, %p621_p1 }
   0xb   :  { %p624_p4 = pnand %p623_p3, %p617_p0 }
   0xd   :  { %627 = shalt.err (!%p624_p4)
}
   0xe   :  { %41 = dma.hbm_to_vmem [thread:$0]  %s902_s1, 128, %s39_s22, [#allocation6]  }
   0xf   :  { %s636_s28 = scalar_lea.vmem %s58_s24, 256  ;;  %p641_p6 = scmp.lt.s32.totalorder %s58_s24, %s58_s24 }
  0x10   :  { %p637_p5 = scmp.ne.s32.totalorder %s58_s24, %s636_s28  ;;  %p642_p7 = scmp.lt.s32.totalorder %s636_s28, %s636_s28 }
  0x12   :  { %p643_p8 = por %p642_p7, %p641_p6 }
  0x14   :  { %p644_p9 = pnand %p643_p8, %p637_p5 }
  0x16   :  { %647 = shalt.err (!%p644_p9)
}
  0x17   :  { %s780_s29 = smov 128   ;;  %s781_s30 = smov 8  }
  0x18   :  { %63 = dma.hbm_to_vmem [thread:$0]  %s904_s3, 256, %s58_s24, [#allocation9], %s780_s29, %s780_s29, %s781_s30  }
  0x19   :  { %s782_s15 = smov [#allocation11]   ;;  %s783_s17 = smov [#allocation2]  }
  0x1a   :  { %s81_s16 = sshll.u32 %s782_s15, 4  ;;  %s28_s18 = sshll.u32 %s783_s17, 4  ;;  %s82_s16 = int_to_ptr.vmem [resolvable:$true] %s81_s16  ;;  %s29_s18 = int_to_ptr.vmem [resolvable:$true] %s28_s18 }
  0x1b   :  { %s656_s1 = scalar_lea.vmem %s82_s16, 512  ;;  %p661_p11 = scmp.lt.s32.totalorder %s82_s16, %s82_s16 }
  0x1c   :  { %p657_p10 = scmp.ne.s32.totalorder %s82_s16, %s656_s1  ;;  %p662_p12 = scmp.lt.s32.totalorder %s656_s1, %s656_s1 }
  0x1e   :  { %p663_p13 = por %p662_p12, %p661_p11 }
  0x20   :  { %p664_p0 = pnand %p663_p13, %p657_p10 }
  0x22   :  { %667 = shalt.err (!%p664_p0)
}
  0x23   :  { %87 = dma.hbm_to_vmem [thread:$0]  %s907_s6, 512, %s82_s16, [#allocation12], %s780_s29, %s780_s29, %s781_s30  }
  0x24   :  { %s676_s21 = scalar_lea.vmem %s29_s18, 128  ;;  %p681_p2 = scmp.lt.s32.totalorder %s29_s18, %s29_s18 }
  0x25   :  { %p677_p1 = scmp.ne.s32.totalorder %s29_s18, %s676_s21  ;;  %p682_p3 = scmp.lt.s32.totalorder %s676_s21, %s676_s21 }
  0x27   :  { %p683_p4 = por %p682_p3, %p681_p2 }
  0x29   :  { %p684_p5 = pnand %p683_p4, %p677_p1 }
  0x2b   :  { %687 = shalt.err (!%p684_p5)
}
  0x2c   :  { %31 = dma.hbm_to_vmem [thread:$0]  %s901_s0, 128, %s29_s18, [#allocation3]  }
  0x2d   :  { %s784_s23 = smov [#allocation7]   ;;  %s785_s25 = smov [#allocation10]  }
  0x2e   :  { %s48_s24 = sshll.u32 %s784_s23, 4  ;;  %s70_s26 = sshll.u32 %s785_s25, 4  ;;  %s49_s24 = int_to_ptr.vmem [resolvable:$true] %s48_s24  ;;  %s71_s26 = int_to_ptr.vmem [resolvable:$true] %s70_s26 }
  0x2f   :  { %s696_s27 = scalar_lea.vmem %s49_s24, 128  ;;  %p701_p7 = scmp.lt.s32.totalorder %s49_s24, %s49_s24 }
  0x30   :  { %p697_p6 = scmp.ne.s32.totalorder %s49_s24, %s696_s27  ;;  %p702_p8 = scmp.lt.s32.totalorder %s696_s27, %s696_s27 }
  0x32   :  { %p703_p9 = por %p702_p8, %p701_p7 }
  0x34   :  { %p704_p10 = pnand %p703_p9, %p697_p6 }
  0x36   :  { %707 = shalt.err (!%p704_p10)
}
  0x37   :  { %51 = dma.hbm_to_vmem [thread:$0]  %s903_s2, 128, %s49_s24, [#allocation6]  }
  0x38   :  { %s716_s29 = scalar_lea.vmem %s71_s26, 128  ;;  %p721_p12 = scmp.lt.s32.totalorder %s71_s26, %s71_s26 }
  0x39   :  { %p717_p11 = scmp.ne.s32.totalorder %s71_s26, %s716_s29  ;;  %p722_p13 = scmp.lt.s32.totalorder %s716_s29, %s716_s29 }
  0x3b   :  { %p723_p0 = por %p722_p13, %p721_p12 }
  0x3d   :  { %p724_p1 = pnand %p723_p0, %p717_p11 }
  0x3f   :  { %727 = shalt.err (!%p724_p1)
}
  0x40   :  { %73 = dma.hbm_to_vmem [thread:$0]  %s905_s4, 128, %s71_s26, [#allocation9]  }
  0x41   :  { %s786_s13 = smov [#allocation13]  }
  0x42   :  { %s95_s14 = sshll.u32 %s786_s13, 4  ;;  %s96_s14 = int_to_ptr.vmem [resolvable:$true] %s95_s14 }
  0x43   :  { %s736_s15 = scalar_lea.vmem %s96_s14, 1024  ;;  %p741_p3 = scmp.lt.s32.totalorder %s96_s14, %s96_s14 }
  0x44   :  { %p737_p2 = scmp.ne.s32.totalorder %s96_s14, %s736_s15  ;;  %p742_p4 = scmp.lt.s32.totalorder %s736_s15, %s736_s15 }
  0x46   :  { %p743_p5 = por %p742_p4, %p741_p3 }
  0x48   :  { %p744_p6 = pnand %p743_p5, %p737_p2 }
  0x4a   :  { %747 = shalt.err (!%p744_p6)
}
  0x4b   :  { %s787_s2 = smov 256   ;;  %s788_s16 = smov 16  }
  0x4c   :  { %101 = dma.hbm_to_vmem [thread:$0]  %s909_s8, 1024, %s96_s14, [#allocation12], %s787_s2, %s787_s2, %s788_s16  }
  0x4d   :  { %768 = dma.done.wait [#allocation3], 128  }
  0x4e   :  { %769 = vsyncadd [#allocation3], 4294967168 }
  0x4f   :  { %770 = dma.done.wait [#allocation6], 256  }
  0x50   :  { %771 = vsyncadd [#allocation6], 4294967040 }
  0x51   :  { %772 = dma.done.wait [#allocation9], 384  }
  0x52   :  { %773 = vsyncadd [#allocation9], 4294966912 }
  0x53   :  { %774 = dma.done.wait [#allocation12], 1536  }
  0x54   :  { %775 = vsyncadd [#allocation12], 4294965760  ;;  %v789_v0 = vmov 0.0   ;;  %vm790_vm0 = vmmov 0   ;;  %vm134_vm1 = vcmask 64512   ;;  %v133_v1 = vld [vmem:[#allocation10] sm:$0xff]  ;;  %v387_v31 = vlaneseq }
  0x55   :  { %561 = vmatprep.subr.mxu0 %v789_v0  ;;  %566 = vmatprep.subr.mxu1 %v789_v0  ;;  %v131_v2 = vld [vmem:[#allocation8 + $0x8] sm:$0xff]  ;;  %v132_v3 = vld [vmem:[#allocation5] sm:$0xff]  ;;  %v130_v4 = vld [vmem:[#allocation8] sm:$0xff]  ;;  %vm208_vm2 = vcmask 130048   ;;  %vm302_vm3 = vcmask 261120  }
  0x56   :  { %563 = vmatprep.mubr.msk.f32.mxu0 %vm790_vm0, %v789_v0  ;;  %570 = vmatprep.mubr.msk.f32.mxu1 %vm790_vm0, %v789_v0  ;;  %v129_v5 = vld [vmem:[#allocation2] sm:$0xff]  ;;  %v294_v6 = vld [vmem:[#allocation11 + $0x18] sm:$0xff]  ;;  %v292_v8 = vld [vmem:[#allocation11 + $0x8] sm:$0xff]  ;;  %v388_v32 = vshrl.u32 %v387_v31, 7 }
  0x57   :  { %562 = vmatpush3.msra.mxu0 %v133_v1  ;;  %567 = vmatpush3.msra.mxu1 %v131_v2  ;;  %v293_v7 = vld [vmem:[#allocation11 + $0x10] sm:$0xff]  ;;  %v291_v9 = vld [vmem:[#allocation11] sm:$0xff]  ;;  %v384_v10 = vld [vmem:[#allocation13 + $0x38] sm:$0xff] }
  0x58   :  { %564 = vmatmul.mubr.msk.f32.vlgmr.msra.gmra.mxu0 %vm134_vm1, %v132_v3  ;;  %568 = vmatprep.subr.mxu1 %v789_v0  ;;  %v383_v11 = vld [vmem:[#allocation13 + $0x30] sm:$0xff]  ;;  %v382_v12 = vld [vmem:[#allocation13 + $0x28] sm:$0xff]  ;;  %v381_v21 = vld [vmem:[#allocation13 + $0x20] sm:$0xff]  ;;  %v393_v33 = vsub.s32 1, %v388_v32 }
  0x59   :  { %569 = vmatpush3.msra.mxu1 %v130_v4  ;;  %573 = vmatprep.subr.mxu0 %v789_v0  ;;  %v545_v16 = vld [vmem:[%s906_s5] ss:$0 sm:$0xff]  ;;  %v380_v22 = vld [vmem:[#allocation13 + $0x18] sm:$0xff]  ;;  %v378_v24 = vld [vmem:[#allocation13 + $0x8] sm:$0xff] }
  0x5a   :  { %571 = vmatmul.mubr.msk.f32.vlgmr.msra.gmra.mxu1 %vm208_vm2, %v129_v5  ;;  %581 = vmatprep.mubr.msk.f32.mxu0 %vm790_vm0, %v789_v0  ;;  %v379_v23 = vld [vmem:[#allocation13 + $0x10] sm:$0xff]  ;;  %v377_v25 = vld [vmem:[#allocation13] sm:$0xff] }
  0x5b   :  { %464 = vmatprep.mubr.f32.mxu1 %v789_v0  ;;  %574 = vmatpush3.msra.mxu0 %v294_v6  ;;  %v546_v26 = vld [vmem:[%s908_s7] ss:$0 sm:$0xff] }
  0x5c   :  { %575 = vmatprep.subr.mxu0 %v789_v0  ;;  %424 = vmatprep.subr.mxu1 %v384_v10  ;;  %v385_v34 = vld [vmem:[%s910_s9] sm:$0x3]  ;;  %v389_v10 = vsub.s32 0, %v388_v32 }
  0x5d   :  { %576 = vmatpush3.msra.mxu0 %v293_v7  ;;  %425 = vmatpush1.msra.mxu1 %v383_v11  ;;  %v394_v35 = vrot.slane %v385_v34, %v393_v33  ;;  %v549_v38 = vld [vmem:[%s911_s10] ss:$0 sm:$0xff]  ;;  %s791_s10 = smov [#allocation14]  }
  0x5e   :  { %577 = vmatprep.subr.mxu0 %v789_v0  ;;  %426 = vmatprep.subr.mxu1 %v382_v12  ;;  %v550_v55 = vld [vmem:[%s912_s11] ss:$0 sm:$0xff]  ;;  %v390_v11 = vrot.slane %v385_v34, %v389_v10  ;;  %v521_v12 = vld [vmem:[#allocation7] sm:$0xff]  ;;  %s531_s11 = sshll.u32 %s791_s10, 4  ;;  %s532_s11 = int_to_ptr.vmem [resolvable:$true] %s531_s11 }
  0x5f   :  { %578 = vmatpush3.msra.mxu0 %v292_v8  ;;  %427 = vmatpush1.msra.mxu1 %v381_v21  ;;  %s748_s22 = scalar_lea.vmem %s532_s11, 128  ;;  %p753_p8 = scmp.lt.s32.totalorder %s532_s11, %s532_s11 }
  0x60   :  { %579 = vmatprep.subr.mxu0 %v789_v0  ;;  %428 = vmatprep.subr.mxu1 %v380_v22  ;;  %p749_p7 = scmp.ne.s32.totalorder %s532_s11, %s748_s22  ;;  %p754_p9 = scmp.lt.s32.totalorder %s748_s22, %s748_s22 }
  0x61   :  { %580 = vmatpush3.msra.mxu0 %v291_v9  ;;  %429 = vmatpush1.msra.mxu1 %v379_v23 }
  0x62   :  { %430 = vmatprep.subr.mxu1 %v378_v24  ;;  %p755_p10 = por %p754_p9, %p753_p8 }
  0x63   :  { %431 = vmatpush1.msra.mxu1 %v377_v25 }
  0x64   :  { %p756_p11 = pnand %p755_p10, %p749_p7 }
 0x118   :  { %v204_v13 = vpop.f32.mrf.mxu0 }
 0x11a   :  { %v565_v14 = vpop.f32.mrf.mxu0  ;;  %v278_v15 = vpop.f32.mrf.mxu1 }
 0x11b   :  { %v279_v17 = vadd.f32 %v278_v15, %v204_v13 }
 0x11c   :  { %v572_v18 = vpop.f32.mrf.mxu1 }
 0x11d   :  { %v289_v19 = vadd.f32 %v545_v16, %v279_v17 }
 0x11f   :  { %v290_v20 = vmax.f32 %v289_v19, 0.0 }
 0x121   :  { %582 = vmatmul.mubr.msk.f32.vlgmr.msra.gmra.mxu0 %vm302_vm3, %v290_v20 }
 0x1e1   :  { %v372_v27 = vpop.f32.mrf.mxu0 }
 0x1e2   :  { %v373_v28 = vadd.f32 %v546_v26, %v372_v27 }
 0x1e3   :  { %v583_v29 = vpop.f32.mrf.mxu0 }
 0x1e4   :  { %v376_v30 = vmax.f32 %v373_v28, 0.0 }
 0x1e6   :  { %548 = vmatmul.mubr.msk.f32.vlgmr.msra.gmra.mxu1 %vm302_vm3, %v376_v30 }
 0x2a6   :  { %v466_v36 = vpop.f32.mrf.mxu1 }
 0x2a7   :  { %v467_v14 = vadd.f32 %v466_v36, %v390_v11 }
 0x2a8   :  { %v468_v37 = vpop.f32.mrf.mxu1 }
 0x2a9   :  { %v469_v39 = vadd.f32 %v468_v37, %v394_v35 }
 0x2ab   :  { %v479_v40 = vsub.f32 %v549_v38, %v469_v39 }
 0x2ad   :  { %v481_v41 = vand.u32 2147483647, %v479_v40  ;;  %v480_v52 = vmax.f32 %v479_v40, 0.0 }
 0x2af   :  { %v482_v42 = vsub.f32 0.0, %v481_v41 }
 0x2b1   :  { %v483_v43 = vmul.f32 1.442695, %v482_v42 }
 0x2b3   :  { %598 = vpow2.f32 %v483_v43 }
 0x2c0   :  { %v599_v44 = vpop.eup %598 }
 0x2c1   :  { %v485_v45 = vadd.f32 1.0, %v599_v44  ;;  %v488_v46 = vmul.f32 -0.5, %v599_v44  ;;  %v491_v48 = vand.u32 2147483647, %v599_v44 }
 0x2c3   :  { %600 = vlog2.f32 %v485_v45  ;;  %v489_v47 = vadd.f32 1.0, %v488_v46  ;;  %vm492_vm4 = vcmp.lt.f32.partialorder %v491_v48, 0.0004427343 }
 0x2c5   :  { %v490_v51 = vmul.f32 %v599_v44, %v489_v47 }
 0x2d0   :  { %v601_v49 = vpop.eup %600 }
 0x2d1   :  { %v487_v50 = vmul.f32 0.6931472, %v601_v49 }
 0x2d3   :  { %v493_v53 = vsel %vm492_vm4, %v490_v51, %v487_v50 }
 0x2d4   :  { %v494_v54 = vadd.f32 %v493_v53, %v480_v52 }
 0x2d6   :  { %v495_v56 = vsub.f32 %v549_v38, %v494_v54 }
 0x2d8   :  { %v502_v57 = vsub.f32 %v495_v56, %v550_v55 }
 0x2da   :  { %v504_v58 = vand.u32 2147483647, %v502_v57  ;;  %v503_v5 = vmax.f32 %v502_v57, 0.0 }
 0x2dc   :  { %v505_v59 = vsub.f32 0.0, %v504_v58 }
 0x2de   :  { %v506_v60 = vmul.f32 1.442695, %v505_v59 }
 0x2e0   :  { %602 = vpow2.f32 %v506_v60 }
 0x2ed   :  { %v603_v61 = vpop.eup %602 }
 0x2ee   :  { %v508_v62 = vadd.f32 1.0, %v603_v61  ;;  %v511_v63 = vmul.f32 -0.5, %v603_v61  ;;  %v514_v1 = vand.u32 2147483647, %v603_v61 }
 0x2f0   :  { %604 = vlog2.f32 %v508_v62  ;;  %v512_v0 = vadd.f32 1.0, %v511_v63  ;;  %vm515_vm5 = vcmp.lt.f32.partialorder %v514_v1, 0.0004427343 }
 0x2f2   :  { %v513_v4 = vmul.f32 %v603_v61, %v512_v0 }
 0x2fd   :  { %v605_v2 = vpop.eup %604 }
 0x2fe   :  { %v510_v3 = vmul.f32 0.6931472, %v605_v2 }
 0x300   :  { %v516_v6 = vsel %vm515_vm5, %v513_v4, %v510_v3 }
 0x301   :  { %v517_v7 = vadd.f32 %v516_v6, %v503_v5 }
 0x303   :  { %v518_v8 = vadd.f32 %v550_v55, %v517_v7 }
 0x305   :  { %v519_v9 = vmul.f32 1.442695, %v518_v8 }
 0x307   :  { %606 = vpow2.f32 %v519_v9 }
 0x314   :  { %v607_v13 = vpop.eup %606 }
 0x315   :  { %v522_v15 = vmul.f32 %v607_v13, %v521_v12 }
 0x317   :  { %v523_v16 = vadd.f32 %v522_v15, %v467_v14 }
 0x319   :  { %524 = vst [vmem:[#allocation14] sm:$0xff] %v523_v16 }
 0x31a   :  { %759 = shalt.err (!%p756_p11)
}
 0x31b   :  { %534 = dma.vmem_to_hbm [thread:$0]  %s532_s11, 128, %s913_s12, [#allocation4]  }
 0x31c   :  { %776 = dma.done.wait [#allocation4], 128  }
 0x31d   :  { %777 = vsyncadd [#allocation4], 4294967168 }
 0x31e   :  { %538 = vsyncpa [#allocation3], 1 }
 0x31f   :  { %539 = vsyncpa [#allocation6], 1 }
 0x320   :  { %540 = vsyncpa [#allocation9], 1 }
 0x321   :  { %541 = vsyncpa [#allocation12], 1 }
 0x322   :  { %542 = vsyncpa [#allocation4], 1 }

</bundles_post_ra>
